<compile_context>
chip_gen: v5e
topology: v5e:2x2
jax: 0.10.0
libtpu: 0.0.40
codegen_flags: <defaults>
</compile_context>

<pallas_src>
import functools

import jax
import jax.numpy as jnp
from jax import lax
from jax.experimental import pallas as pl
from jax.experimental.pallas import tpu as pltpu


# ----------------------------- config -----------------------------------
class Config:
    char_embed_num = 32          # char vocab size
    char_embed_dim = 8           # char embedding dim
    char_cnn_filters = [(1, 8), (2, 8), (3, 16)]   # (width, num) -> n_filters = 32
    n_filters = 32
    n_highway = 2
    projection_dim = 16
    n_layers = 2
    # Matmul-operand dtype (f32 accumulation, f32 elementwise everywhere).
    # Use jnp.float32 to reproduce the PyTorch reference bit-for-bit.
    compute_dtype = jnp.bfloat16


_LSTM_BATCH_TILE = 8                    # sublane-aligned batch tile
_VMEM_LIMIT_BYTES = 48 * 1024 * 1024    # headroom under v7x's 64 MiB physical VMEM


def _interleave_gates(a, b, p):
    """[R,4P],[R,4P] -> [R,8P] with P-wide blocks ordered i_a,i_b,f_a,f_b,g_a,g_b,o_a,o_b."""
    parts = []
    for g in range(4):
        parts.append(a[:, g * p:(g + 1) * p])
        parts.append(b[:, g * p:(g + 1) * p])
    return jnp.concatenate(parts, axis=-1)


# ------------- kernel: fused char-CNN + highway + projection -------------
def make_charcnn_kernel(filters, col_bases, max_chars, n_highway, n_filters,
                        compute_dtype):
    def kernel(emb_ref, *refs):
        o_ref = refs[-1]
        w = refs[:-1]
        x = emb_ref[...]                                   # [tn, C*E] compute dtype

        # One lane-dense im2col matmul for all filters & positions (instead of
        # many K<=24, N<=16 matmuls + per-position window concats).
        conv = jnp.dot(x, w[0][...], preferred_element_type=jnp.float32)

        pooled = []
        for (width, num), base in zip(filters, col_bases):
            t_pos = max_chars - width + 1
            m = conv[:, base:base + num]
            for t in range(1, t_pos):                      # cheap VPU/XLU max-reduce
                m = jnp.maximum(m, conv[:, base + t * num:base + (t + 1) * num])
            pooled.append(m)
        h = jnp.concatenate(pooled, axis=-1) if len(pooled) > 1 else pooled[0]
        # conv bias is time-constant -> commutes with max-over-time; then ReLU.
        h = jnp.maximum(h + w[1][...], 0.0)                # [tn, F] f32

        idx = 2
        for _ in range(n_highway):
            hw = jnp.dot(h.astype(compute_dtype), w[idx][...],
                         preferred_element_type=jnp.float32) + w[idx + 1][...]
            idx += 2
            nonlinear = jnp.maximum(hw[:, :n_filters], 0.0)
            gate = jax.nn.sigmoid(hw[:, n_filters:])       # f32 gate math (v5e: no bf16 VPU/EUP)
            h = gate * h + (1.0 - gate) * nonlinear

        # TODO(synk): at this toy projection_dim=16 the store is lane-masked; at
        # real ELMo dims (P=512) the [tokens, P] layout is already lane-dense.
        o_ref[...] = jnp.dot(h.astype(compute_dtype), w[idx][...],
                             preferred_element_type=jnp.float32) + w[idx + 1][...]

    return kernel


def _token_tile(n):
    # Largest sublane-aligned tile that still leaves >= 2 grid steps so the
    # HBM<->VMEM prefetch/writeback pipeline has something to overlap; the 1024
    # cap keeps double-buffered tiles comfortably inside v7x's 64 MiB VMEM.
    for t in (1024, 512, 256, 128, 64, 32, 16, 8):
        if pl.cdiv(n, t) >= 2:
            return t
    return 8


def char_cnn_forward(cfg, prepared, emb_flat, max_chars):
    # emb_flat: [N, C*E] (compute dtype); returns token embeddings [N, P] f32.
    n_tok, c_e = emb_flat.shape
    p_dim = cfg.projection_dim
    weights = prepared["charcnn_weights"]

    tn = _token_tile(n_tok)
    n_pad = pl.cdiv(n_tok, tn) * tn
    if n_pad != n_tok:
        emb_flat = jnp.pad(emb_flat, ((0, n_pad - n_tok), (0, 0)))

    in_specs = [pl.BlockSpec((tn, c_e), lambda i: (i, 0))]
    in_specs += [pl.BlockSpec(a.shape, lambda i: (0, 0)) for a in weights]

    out = pl.pallas_call(
        make_charcnn_kernel(prepared["filters"], prepared["conv_col_bases"],
                            max_chars, cfg.n_highway, cfg.n_filters,
                            cfg.compute_dtype),
        out_shape=jax.ShapeDtypeStruct((n_pad, p_dim), jnp.float32),
        grid=(n_pad // tn,),
        in_specs=in_specs,
        out_specs=pl.BlockSpec((tn, p_dim), lambda i: (i, 0)),
        compiler_params=pltpu.CompilerParams(
            dimension_semantics=("parallel",),
            vmem_limit_bytes=_VMEM_LIMIT_BYTES),
    )(emb_flat, *weights)
    return out[:n_tok]


# ------------- kernel: fused bidirectional LSTM layer --------------------
def bilstm_kernel(x_ref, wihf_ref, wihb_ref, whh_ref, b_ref, o_ref, g_scratch,
                  *, residual, compute_dtype):
    # x_ref / o_ref: [S, bt, 2P] time-major; lanes [:P] = forward chain,
    # lanes [P:] = backward (time-flipped, never flipped back) chain.
    s_len, bt, p2 = x_ref.shape
    p = p2 // 2
    cdt = compute_dtype

    # Hoisted, time-independent input projections: one big MXU matmul per
    # direction, completely off the serial recurrent dependency chain.
    x2 = x_ref[...].reshape(s_len * bt, p2)
    gf = jnp.dot(x2[:, :p].astype(cdt), wihf_ref[...],
                 preferred_element_type=jnp.float32)
    gb = jnp.dot(x2[:, p:].astype(cdt), wihb_ref[...],
                 preferred_element_type=jnp.float32)
    g_all = _interleave_gates(gf, gb, p) + b_ref[...]       # [S*bt, 8P] f32
    g_scratch[...] = g_all.reshape(s_len, bt, 4 * p2)

    whh = whh_ref[...]                                      # [2P, 8P] block-diag fwd|bwd

    def step(t, carry):
        h_cat, c_cat = carry                                # [bt, 2P] f32 each
        # ONE fused MXU push per step for both directions on the serial chain.
        g = g_scratch[t] + jnp.dot(h_cat.astype(cdt), whh,
                                   preferred_element_type=jnp.float32)
        i_g = jax.nn.sigmoid(g[:, 0 * p2:1 * p2])           # [i_f | i_b]  (f32 elementwise)
        f_g = jax.nn.sigmoid(g[:, 1 * p2:2 * p2])           # [f_f | f_b]
        g_g = jnp.tanh(g[:, 2 * p2:3 * p2])                 # [g_f | g_b]
        o_g = jax.nn.sigmoid(g[:, 3 * p2:4 * p2])           # [o_f | o_b]
        c_cat = f_g * c_cat + i_g * g_g
        h_cat = o_g * jnp.tanh(c_cat)
        h_out = h_cat + x_ref[t] if residual else h_cat     # residual on output only
        o_ref[t] = h_out    # single full-width store: no per-step lane concat/slices
        return (h_cat, c_cat)

    init = (jnp.zeros((bt, p2), jnp.float32),
            jnp.zeros((bt, p2), jnp.float32))
    lax.fori_loop(0, s_len, step, init, unroll=True)


def bilstm_layer(x_cat, fused_params, residual, compute_dtype):
    s_len, b_pad, p2 = x_cat.shape
    wihf, wihb, whh_cat, b_cat = fused_params
    bt = min(b_pad, _LSTM_BATCH_TILE)        # batch tile; "parallel" grid over batch
    return pl.pallas_call(
        functools.partial(bilstm_kernel, residual=residual,
                          compute_dtype=compute_dtype),
        out_shape=jax.ShapeDtypeStruct((s_len, b_pad, p2), jnp.float32),
        grid=(b_pad // bt,),
        in_specs=[pl.BlockSpec((s_len, bt, p2), lambda i: (0, i, 0)),
                  pl.BlockSpec(wihf.shape, lambda i: (0, 0)),
                  pl.BlockSpec(wihb.shape, lambda i: (0, 0)),
                  pl.BlockSpec(whh_cat.shape, lambda i: (0, 0)),
                  pl.BlockSpec(b_cat.shape, lambda i: (0, 0))],
        out_specs=pl.BlockSpec((s_len, bt, p2), lambda i: (0, i, 0)),
        scratch_shapes=[pltpu.VMEM((s_len, bt, 4 * p2), jnp.float32)],
        compiler_params=pltpu.CompilerParams(
            dimension_semantics=("parallel",),   # batch tiles shard across TCs (v7x)
            vmem_limit_bytes=_VMEM_LIMIT_BYTES),
    )(x_cat, wihf, wihb, whh_cat, b_cat)


# --------------------------- parameter setup -----------------------------
def init_params(cfg, key):
    keys = iter(jax.random.split(key, 64))
    p = {}
    p["char_emb"] = jax.random.normal(
        next(keys), (cfg.char_embed_num, cfg.char_embed_dim), jnp.float32) * 0.1
    p["conv"] = []
    for (width, num) in cfg.char_cnn_filters:
        w = jax.random.normal(next(keys), (width, cfg.char_embed_dim, num),
                              jnp.float32) * 0.1
        b = jax.random.normal(next(keys), (1, num), jnp.float32) * 0.1
        p["conv"].append((w, b))
    p["highway"] = []
    for _ in range(cfg.n_highway):
        w = jax.random.normal(next(keys), (cfg.n_filters, 2 * cfg.n_filters),
                              jnp.float32) * 0.1
        b = jax.random.normal(next(keys), (1, 2 * cfg.n_filters),
                              jnp.float32) * 0.1
        p["highway"].append((w, b))
    p["proj_w"] = jax.random.normal(
        next(keys), (cfg.n_filters, cfg.projection_dim), jnp.float32) * 0.1
    p["proj_b"] = jax.random.normal(
        next(keys), (1, cfg.projection_dim), jnp.float32) * 0.1

    def lstm_dir():
        pd = cfg.projection_dim
        wih = jax.random.normal(next(keys), (pd, 4 * pd), jnp.float32) * 0.1
        whh = jax.random.normal(next(keys), (pd, 4 * pd), jnp.float32) * 0.1
        b_ih = jax.random.normal(next(keys), (1, 4 * pd), jnp.float32) * 0.1
        b_hh = jax.random.normal(next(keys), (1, 4 * pd), jnp.float32) * 0.1
        return (wih, whh, b_ih + b_hh)       # PyTorch adds both biases

    p["lstm_fwd"] = [lstm_dir() for _ in range(cfg.n_layers)]
    p["lstm_bwd"] = [lstm_dir() for _ in range(cfg.n_layers)]
    p["rep_weights"] = jax.random.normal(next(keys), (cfg.n_layers + 1,),
                                         jnp.float32)
    return p


def prepare_params(cfg, p, max_chars):
    """One-time weight preprocessing: im2col conv weight, fused/interleaved
    bidirectional LSTM weights, bf16 casts of matmul operands."""
    dt = cfg.compute_dtype
    c, e, pd = max_chars, cfg.char_embed_dim, cfg.projection_dim

    # im2col conv weight: zero-shifted copies of every filter for every valid
    # position -> [C*E, sum(T_i * num_i)].
    cols, bases, off = [], [], 0
    for (w, _) in p["conv"]:
        width, _, num = w.shape
        t_pos = c - width + 1
        bases.append(off)
        for t in range(t_pos):
            col = jnp.zeros((c, e, num), jnp.float32).at[t:t + width].set(w)
            cols.append(col.reshape(c * e, num))
        off += t_pos * num
    wim = jnp.concatenate(cols, axis=-1)
    bconv = jnp.concatenate([b for (_, b) in p["conv"]], axis=-1)   # [1, F]

    charcnn_w = [wim.astype(dt), bconv.astype(jnp.float32)]
    for (w, b) in p["highway"]:
        charcnn_w += [w.astype(dt), b.astype(jnp.float32)]
    charcnn_w += [p["proj_w"].astype(dt), p["proj_b"].astype(jnp.float32)]

    lstm = []
    for layer in range(cfg.n_layers):
        wih_f, whh_f, b_f = p["lstm_fwd"][layer]
        wih_b, whh_b, b_b = p["lstm_bwd"][layer]
        # Block-diagonal recurrent weight with interleaved gate columns so one
        # [hf|hb] @ W_hh push per step serves both directions.
        whh_cat = jnp.concatenate(
            [_interleave_gates(whh_f, jnp.zeros_like(whh_f), pd),
             _interleave_gates(jnp.zeros_like(whh_b), whh_b, pd)], axis=0)
        b_cat = _interleave_gates(b_f, b_b, pd)
        lstm.append((wih_f.astype(dt), wih_b.astype(dt),
                     whh_cat.astype(dt), b_cat.astype(jnp.float32)))

    return {"char_emb": p["char_emb"].astype(dt),
            "charcnn_weights": charcnn_w,
            "conv_col_bases": tuple(bases),
            "filters": tuple((w.shape[0], w.shape[2]) for (w, _) in p["conv"]),
            "lstm": lstm,
            "rep_weights": p["rep_weights"]}


# ------------------------------ forward ----------------------------------
def elmo_representation(cfg, prepared, x):
    # x: [B, S, C] int32 character ids
    b_sz, s_len, max_chars = x.shape
    p_dim = cfg.projection_dim

    # Char-embedding gather (XLA glue), laid out time-major so the char-CNN
    # output reshapes straight into the LSTM layout with no transpose.
    emb = prepared["char_emb"][x]                            # [B, S, C, E]
    emb = jnp.transpose(emb, (1, 0, 2, 3)).reshape(
        s_len * b_sz, max_chars * cfg.char_embed_dim)        # [S*B, C*E]

    tok = char_cnn_forward(cfg, prepared, emb, max_chars)    # [S*B, P] f32
    tok = tok.reshape(s_len, b_sz, p_dim)                    # time-major [S, B, P]

    # Pad batch to a multiple of 8 sublanes for the recurrent kernels.
    b_pad = max(_LSTM_BATCH_TILE, -(-b_sz // 8) * 8)
    if b_pad != b_sz:
        tok = jnp.pad(tok, ((0, 0), (0, b_pad - b_sz), (0, 0)))

    fwd = tok
    bwd = tok[::-1]           # x.flip(1) in time-major; needed for outputs[0] anyway
    cache = jnp.concatenate([fwd, bwd], axis=-1)             # [S, B_pad, 2P]
    outputs_tm = [cache]

    # Each layer's [S, B_pad, 2P] output IS the next layer's input: no flip /
    # slice / reshape / transpose / concat HBM round-trips between layers.
    for layer_id in range(cfg.n_layers):
        cache = bilstm_layer(cache, prepared["lstm"][layer_id],
                             residual=(layer_id != 0),
                             compute_dtype=cfg.compute_dtype)
        outputs_tm.append(cache)

    stacked = jnp.stack(outputs_tm, axis=0)[:, :, :b_sz, :]  # [L+1, S, B, 2P]
    stacked = jnp.transpose(stacked, (0, 2, 1, 3))           # [L+1, B, S, 2P]
    # weighted layer sum: trivial VPU work -> plain jnp (no extra kernel launch)
    w = prepared["rep_weights"].reshape(-1, 1, 1, 1)
    elmo_rep = (stacked * w).sum(axis=0)                     # [B, S, 2P]
    return stacked, elmo_rep


# -------------------------------- main ------------------------------------
if __name__ == "__main__":
    cfg = Config()
    key = jax.random.PRNGKey(0)
    k_x, k_p = jax.random.split(key)

    batch, seq_len, max_chars = 2, 8, 7
    x = jax.random.randint(k_x, (batch, seq_len, max_chars), 0,
                           cfg.char_embed_num, dtype=jnp.int32)

    raw_params = init_params(cfg, k_p)
    prepared = prepare_params(cfg, raw_params, max_chars)

    outputs, elmo_rep = elmo_representation(cfg, prepared, x)
    jax.block_until_ready(outputs)
    jax.block_until_ready(elmo_rep)

    assert outputs.shape == (cfg.n_layers + 1, batch, seq_len,
                             2 * cfg.projection_dim)
    assert elmo_rep.shape == (batch, seq_len, 2 * cfg.projection_dim)
    assert bool(jnp.all(jnp.isfinite(outputs)))
    print("KERNEL_OK")
</pallas_src>

<mosaic_0001>
module attributes {stable_mosaic.version = 11 : i64} {
  func.func @kernel(%arg0: i32, %arg1: memref<8x56xbf16, #tpu.memory_space<vmem>>, %arg2: memref<56x184xbf16, #tpu.memory_space<vmem>>, %arg3: memref<1x32xf32, #tpu.memory_space<vmem>>, %arg4: memref<32x64xbf16, #tpu.memory_space<vmem>>, %arg5: memref<1x64xf32, #tpu.memory_space<vmem>>, %arg6: memref<32x64xbf16, #tpu.memory_space<vmem>>, %arg7: memref<1x64xf32, #tpu.memory_space<vmem>>, %arg8: memref<32x16xbf16, #tpu.memory_space<vmem>>, %arg9: memref<1x16xf32, #tpu.memory_space<vmem>>, %arg10: memref<8x16xf32, #tpu.memory_space<vmem>>) attributes {dimension_semantics = [#tpu.dimension_semantics<parallel>], iteration_bounds = array<i64: 2>, scalar_prefetch = 0 : i64, scratch_operands = 0 : i64, tpu.core_type = #tpu.core_type<tc>, window_params = [{transform_indices = @transform_0, window_bounds = array<i64: 8, 56>}, {pipeline_mode = #tpu.pipeline_mode<synchronous>, transform_indices = @transform_1, window_bounds = array<i64: 56, 184>}, {pipeline_mode = #tpu.pipeline_mode<synchronous>, transform_indices = @transform_2, window_bounds = array<i64: 1, 32>}, {pipeline_mode = #tpu.pipeline_mode<synchronous>, transform_indices = @transform_3, window_bounds = array<i64: 32, 64>}, {pipeline_mode = #tpu.pipeline_mode<synchronous>, transform_indices = @transform_4, window_bounds = array<i64: 1, 64>}, {pipeline_mode = #tpu.pipeline_mode<synchronous>, transform_indices = @transform_5, window_bounds = array<i64: 32, 64>}, {pipeline_mode = #tpu.pipeline_mode<synchronous>, transform_indices = @transform_6, window_bounds = array<i64: 1, 64>}, {pipeline_mode = #tpu.pipeline_mode<synchronous>, transform_indices = @transform_7, window_bounds = array<i64: 32, 16>}, {pipeline_mode = #tpu.pipeline_mode<synchronous>, transform_indices = @transform_8, window_bounds = array<i64: 1, 16>}, {transform_indices = @transform_9, window_bounds = array<i64: 8, 16>}]} {
    %c0 = arith.constant 0 : index
    %c0_0 = arith.constant 0 : index
    %0 = vector.load %arg1[%c0, %c0_0] : memref<8x56xbf16, #tpu.memory_space<vmem>>, vector<8x56xbf16>
    %c0_1 = arith.constant 0 : index
    %c0_2 = arith.constant 0 : index
    %1 = vector.load %arg2[%c0_1, %c0_2] : memref<56x184xbf16, #tpu.memory_space<vmem>>, vector<56x184xbf16>
    %cst = arith.constant dense<0.000000e+00> : vector<8x184xf32>
    %2 = tpu.matmul %0, %1, %cst {dimension_numbers = #tpu.dot_dimension_numbers<[1], [0], [0], [1], [0, 0, 1, 1], [], []>} : vector<8x56xbf16>, vector<56x184xbf16>, vector<8x184xf32> -> vector<8x184xf32>
    %3 = vector.extract_strided_slice %2 {offsets = [0, 0], sizes = [8, 8], strides = [1, 1]} : vector<8x184xf32> to vector<8x8xf32>
    %4 = vector.extract_strided_slice %2 {offsets = [0, 8], sizes = [8, 8], strides = [1, 1]} : vector<8x184xf32> to vector<8x8xf32>
    %5 = arith.maximumf %3, %4 : vector<8x8xf32>
    %6 = vector.extract_strided_slice %2 {offsets = [0, 16], sizes = [8, 8], strides = [1, 1]} : vector<8x184xf32> to vector<8x8xf32>
    %7 = arith.maximumf %5, %6 : vector<8x8xf32>
    %8 = vector.extract_strided_slice %2 {offsets = [0, 24], sizes = [8, 8], strides = [1, 1]} : vector<8x184xf32> to vector<8x8xf32>
    %9 = arith.maximumf %7, %8 : vector<8x8xf32>
    %10 = vector.extract_strided_slice %2 {offsets = [0, 32], sizes = [8, 8], strides = [1, 1]} : vector<8x184xf32> to vector<8x8xf32>
    %11 = arith.maximumf %9, %10 : vector<8x8xf32>
    %12 = vector.extract_strided_slice %2 {offsets = [0, 40], sizes = [8, 8], strides = [1, 1]} : vector<8x184xf32> to vector<8x8xf32>
    %13 = arith.maximumf %11, %12 : vector<8x8xf32>
    %14 = vector.extract_strided_slice %2 {offsets = [0, 48], sizes = [8, 8], strides = [1, 1]} : vector<8x184xf32> to vector<8x8xf32>
    %15 = arith.maximumf %13, %14 : vector<8x8xf32>
    %16 = vector.extract_strided_slice %2 {offsets = [0, 56], sizes = [8, 8], strides = [1, 1]} : vector<8x184xf32> to vector<8x8xf32>
    %17 = vector.extract_strided_slice %2 {offsets = [0, 64], sizes = [8, 8], strides = [1, 1]} : vector<8x184xf32> to vector<8x8xf32>
    %18 = arith.maximumf %16, %17 : vector<8x8xf32>
    %19 = vector.extract_strided_slice %2 {offsets = [0, 72], sizes = [8, 8], strides = [1, 1]} : vector<8x184xf32> to vector<8x8xf32>
    %20 = arith.maximumf %18, %19 : vector<8x8xf32>
    %21 = vector.extract_strided_slice %2 {offsets = [0, 80], sizes = [8, 8], strides = [1, 1]} : vector<8x184xf32> to vector<8x8xf32>
    %22 = arith.maximumf %20, %21 : vector<8x8xf32>
    %23 = vector.extract_strided_slice %2 {offsets = [0, 88], sizes = [8, 8], strides = [1, 1]} : vector<8x184xf32> to vector<8x8xf32>
    %24 = arith.maximumf %22, %23 : vector<8x8xf32>
    %25 = vector.extract_strided_slice %2 {offsets = [0, 96], sizes = [8, 8], strides = [1, 1]} : vector<8x184xf32> to vector<8x8xf32>
    %26 = arith.maximumf %24, %25 : vector<8x8xf32>
    %27 = vector.extract_strided_slice %2 {offsets = [0, 104], sizes = [8, 16], strides = [1, 1]} : vector<8x184xf32> to vector<8x16xf32>
    %28 = vector.extract_strided_slice %2 {offsets = [0, 120], sizes = [8, 16], strides = [1, 1]} : vector<8x184xf32> to vector<8x16xf32>
    %29 = arith.maximumf %27, %28 : vector<8x16xf32>
    %30 = vector.extract_strided_slice %2 {offsets = [0, 136], sizes = [8, 16], strides = [1, 1]} : vector<8x184xf32> to vector<8x16xf32>
    %31 = arith.maximumf %29, %30 : vector<8x16xf32>
    %32 = vector.extract_strided_slice %2 {offsets = [0, 152], sizes = [8, 16], strides = [1, 1]} : vector<8x184xf32> to vector<8x16xf32>
    %33 = arith.maximumf %31, %32 : vector<8x16xf32>
    %34 = vector.extract_strided_slice %2 {offsets = [0, 168], sizes = [8, 16], strides = [1, 1]} : vector<8x184xf32> to vector<8x16xf32>
    %35 = arith.maximumf %33, %34 : vector<8x16xf32>
    %36 = tpu.concatenate %15, %26, %35 in 1 : vector<8x8xf32>, vector<8x8xf32>, vector<8x16xf32> -> vector<8x32xf32>
    %c0_3 = arith.constant 0 : index
    %c0_4 = arith.constant 0 : index
    %37 = vector.load %arg3[%c0_3, %c0_4] : memref<1x32xf32, #tpu.memory_space<vmem>>, vector<1x32xf32>
    %38 = vector.broadcast %37 : vector<1x32xf32> to vector<8x32xf32>
    %39 = arith.addf %36, %38 : vector<8x32xf32>
    %cst_5 = arith.constant 0.000000e+00 : f32
    %40 = vector.broadcast %cst_5 : f32 to vector<8x32xf32>
    %41 = arith.maximumf %39, %40 : vector<8x32xf32>
    %42 = arith.truncf %41 : vector<8x32xf32> to vector<8x32xbf16>
    %c0_6 = arith.constant 0 : index
    %c0_7 = arith.constant 0 : index
    %43 = vector.load %arg4[%c0_6, %c0_7] : memref<32x64xbf16, #tpu.memory_space<vmem>>, vector<32x64xbf16>
    %cst_8 = arith.constant dense<0.000000e+00> : vector<8x64xf32>
    %44 = tpu.matmul %42, %43, %cst_8 {dimension_numbers = #tpu.dot_dimension_numbers<[1], [0], [0], [1], [0, 0, 1, 1], [], []>} : vector<8x32xbf16>, vector<32x64xbf16>, vector<8x64xf32> -> vector<8x64xf32>
    %c0_9 = arith.constant 0 : index
    %c0_10 = arith.constant 0 : index
    %45 = vector.load %arg5[%c0_9, %c0_10] : memref<1x64xf32, #tpu.memory_space<vmem>>, vector<1x64xf32>
    %46 = vector.broadcast %45 : vector<1x64xf32> to vector<8x64xf32>
    %47 = arith.addf %44, %46 : vector<8x64xf32>
    %48 = vector.extract_strided_slice %47 {offsets = [0, 0], sizes = [8, 32], strides = [1, 1]} : vector<8x64xf32> to vector<8x32xf32>
    %cst_11 = arith.constant 0.000000e+00 : f32
    %49 = vector.broadcast %cst_11 : f32 to vector<8x32xf32>
    %50 = arith.maximumf %48, %49 : vector<8x32xf32>
    %51 = vector.extract_strided_slice %47 {offsets = [0, 32], sizes = [8, 32], strides = [1, 1]} : vector<8x64xf32> to vector<8x32xf32>
    %52 = arith.negf %51 : vector<8x32xf32>
    %53 = math.exp %52 : vector<8x32xf32>
    %cst_12 = arith.constant 1.000000e+00 : f32
    %54 = vector.broadcast %cst_12 : f32 to vector<8x32xf32>
    %55 = arith.addf %54, %53 : vector<8x32xf32>
    %56 = arith.divf %54, %55 : vector<8x32xf32>
    %57 = arith.mulf %56, %41 : vector<8x32xf32>
    %cst_13 = arith.constant 1.000000e+00 : f32
    %58 = vector.broadcast %cst_13 : f32 to vector<8x32xf32>
    %59 = arith.subf %58, %56 : vector<8x32xf32>
    %60 = arith.mulf %59, %50 : vector<8x32xf32>
    %61 = arith.addf %57, %60 : vector<8x32xf32>
    %62 = arith.truncf %61 : vector<8x32xf32> to vector<8x32xbf16>
    %c0_14 = arith.constant 0 : index
    %c0_15 = arith.constant 0 : index
    %63 = vector.load %arg6[%c0_14, %c0_15] : memref<32x64xbf16, #tpu.memory_space<vmem>>, vector<32x64xbf16>
    %cst_16 = arith.constant dense<0.000000e+00> : vector<8x64xf32>
    %64 = tpu.matmul %62, %63, %cst_16 {dimension_numbers = #tpu.dot_dimension_numbers<[1], [0], [0], [1], [0, 0, 1, 1], [], []>} : vector<8x32xbf16>, vector<32x64xbf16>, vector<8x64xf32> -> vector<8x64xf32>
    %c0_17 = arith.constant 0 : index
    %c0_18 = arith.constant 0 : index
    %65 = vector.load %arg7[%c0_17, %c0_18] : memref<1x64xf32, #tpu.memory_space<vmem>>, vector<1x64xf32>
    %66 = vector.broadcast %65 : vector<1x64xf32> to vector<8x64xf32>
    %67 = arith.addf %64, %66 : vector<8x64xf32>
    %68 = vector.extract_strided_slice %67 {offsets = [0, 0], sizes = [8, 32], strides = [1, 1]} : vector<8x64xf32> to vector<8x32xf32>
    %cst_19 = arith.constant 0.000000e+00 : f32
    %69 = vector.broadcast %cst_19 : f32 to vector<8x32xf32>
    %70 = arith.maximumf %68, %69 : vector<8x32xf32>
    %71 = vector.extract_strided_slice %67 {offsets = [0, 32], sizes = [8, 32], strides = [1, 1]} : vector<8x64xf32> to vector<8x32xf32>
    %72 = arith.negf %71 : vector<8x32xf32>
    %73 = math.exp %72 : vector<8x32xf32>
    %cst_20 = arith.constant 1.000000e+00 : f32
    %74 = vector.broadcast %cst_20 : f32 to vector<8x32xf32>
    %75 = arith.addf %74, %73 : vector<8x32xf32>
    %76 = arith.divf %74, %75 : vector<8x32xf32>
    %77 = arith.mulf %76, %61 : vector<8x32xf32>
    %cst_21 = arith.constant 1.000000e+00 : f32
    %78 = vector.broadcast %cst_21 : f32 to vector<8x32xf32>
    %79 = arith.subf %78, %76 : vector<8x32xf32>
    %80 = arith.mulf %79, %70 : vector<8x32xf32>
    %81 = arith.addf %77, %80 : vector<8x32xf32>
    %82 = arith.truncf %81 : vector<8x32xf32> to vector<8x32xbf16>
    %c0_22 = arith.constant 0 : index
    %c0_23 = arith.constant 0 : index
    %83 = vector.load %arg8[%c0_22, %c0_23] : memref<32x16xbf16, #tpu.memory_space<vmem>>, vector<32x16xbf16>
    %cst_24 = arith.constant dense<0.000000e+00> : vector<8x16xf32>
    %84 = tpu.matmul %82, %83, %cst_24 {dimension_numbers = #tpu.dot_dimension_numbers<[1], [0], [0], [1], [0, 0, 1, 1], [], []>} : vector<8x32xbf16>, vector<32x16xbf16>, vector<8x16xf32> -> vector<8x16xf32>
    %c0_25 = arith.constant 0 : index
    %c0_26 = arith.constant 0 : index
    %85 = vector.load %arg9[%c0_25, %c0_26] : memref<1x16xf32, #tpu.memory_space<vmem>>, vector<1x16xf32>
    %86 = vector.broadcast %85 : vector<1x16xf32> to vector<8x16xf32>
    %87 = arith.addf %84, %86 : vector<8x16xf32>
    %c0_27 = arith.constant 0 : index
    %c0_28 = arith.constant 0 : index
    %88 = vector.load %arg10[%c0_27, %c0_28] : memref<8x16xf32, #tpu.memory_space<vmem>>, vector<8x16xf32>
    tpu.vector_store %arg10[%c0_27, %c0_28], %87 {strides = array<i32>} : memref<8x16xf32, #tpu.memory_space<vmem>>, vector<8x16xf32>,
    return
  }
  func.func @transform_0(%arg0: i32) -> (i32, i32) {
    %c0_i32 = arith.constant 0 : i32
    %c0_i32_0 = arith.constant 0 : i32
    return %arg0, %c0_i32 : i32, i32
  }
  func.func @transform_1(%arg0: i32) -> (i32, i32) {
    %c0_i32 = arith.constant 0 : i32
    %c0_i32_0 = arith.constant 0 : i32
    %c0_i32_1 = arith.constant 0 : i32
    return %c0_i32, %c0_i32_0 : i32, i32
  }
  func.func @transform_2(%arg0: i32) -> (i32, i32) {
    %c0_i32 = arith.constant 0 : i32
    %c0_i32_0 = arith.constant 0 : i32
    %c0_i32_1 = arith.constant 0 : i32
    return %c0_i32, %c0_i32_0 : i32, i32
  }
  func.func @transform_3(%arg0: i32) -> (i32, i32) {
    %c0_i32 = arith.constant 0 : i32
    %c0_i32_0 = arith.constant 0 : i32
    %c0_i32_1 = arith.constant 0 : i32
    return %c0_i32, %c0_i32_0 : i32, i32
  }
  func.func @transform_4(%arg0: i32) -> (i32, i32) {
    %c0_i32 = arith.constant 0 : i32
    %c0_i32_0 = arith.constant 0 : i32
    %c0_i32_1 = arith.constant 0 : i32
    return %c0_i32, %c0_i32_0 : i32, i32
  }
  func.func @transform_5(%arg0: i32) -> (i32, i32) {
    %c0_i32 = arith.constant 0 : i32
    %c0_i32_0 = arith.constant 0 : i32
    %c0_i32_1 = arith.constant 0 : i32
    return %c0_i32, %c0_i32_0 : i32, i32
  }
  func.func @transform_6(%arg0: i32) -> (i32, i32) {
    %c0_i32 = arith.constant 0 : i32
    %c0_i32_0 = arith.constant 0 : i32
    %c0_i32_1 = arith.constant 0 : i32
    return %c0_i32, %c0_i32_0 : i32, i32
  }
  func.func @transform_7(%arg0: i32) -> (i32, i32) {
    %c0_i32 = arith.constant 0 : i32
    %c0_i32_0 = arith.constant 0 : i32
    %c0_i32_1 = arith.constant 0 : i32
    return %c0_i32, %c0_i32_0 : i32, i32
  }
  func.func @transform_8(%arg0: i32) -> (i32, i32) {
    %c0_i32 = arith.constant 0 : i32
    %c0_i32_0 = arith.constant 0 : i32
    %c0_i32_1 = arith.constant 0 : i32
    return %c0_i32, %c0_i32_0 : i32, i32
  }
  func.func @transform_9(%arg0: i32) -> (i32, i32) {
    %c0_i32 = arith.constant 0 : i32
    %c0_i32_0 = arith.constant 0 : i32
    return %arg0, %c0_i32 : i32, i32
  }
}

</mosaic_0001>

<bundles_post_ra>
// kernel: tpu_custom_call.1
= control target key start
LH: loop header
LB: loop body
LE: loop exit
PB: predicated region body
PF: predicated region fallthrough
CT: control target
= control target key end

     0   :  { %s1290_s0 = inlined_call_operand.vmem [shape: bf16[16,56], index: 0, kind: input, shape index: {}]   ;;  %s1291_s1 = inlined_call_operand.hbm [shape: bf16[56,184], index: 1, kind: input, shape index: {}]   ;;  %s1292_s2 = inlined_call_operand.vmem [shape: f32[1,32], index: 2, kind: input, shape index: {}]   ;;  %s1293_s3 = inlined_call_operand.vmem [shape: bf16[32,64], index: 3, kind: input, shape index: {}]   ;;  %s1294_s4 = inlined_call_operand.vmem [shape: f32[1,64], index: 4, kind: input, shape index: {}]   ;;  %s1295_s5 = inlined_call_operand.hbm [shape: bf16[32,64], index: 5, kind: input, shape index: {}]   ;;  %s1296_s6 = inlined_call_operand.vmem [shape: f32[1,64], index: 6, kind: input, shape index: {}]   ;;  %s1297_s7 = inlined_call_operand.vmem [shape: bf16[32,16], index: 7, kind: input, shape index: {}]   ;;  %s1298_s8 = inlined_call_operand.vmem [shape: f32[1,16], index: 8, kind: input, shape index: {}]   ;;  %s1299_s9 = inlined_call_operand.hbm [shape: f32[16,16], index: 9, kind: output, shape index: {}]  }
   0x1   :  { %1300 = sst [smem:[#allocation11_spill]] %s1291_s1 }
   0x2   :  { %14 = vsyncpa [#allocation3], 0 }
   0x3   :  { %15 = vsyncpa [#allocation6], 0 }
   0x4   :  { %16 = vsyncpa [#allocation4], 0 }
   0x5   :  { %18 = vsyncpa [#allocation4 + $0x1], 0  ;;  %s1144_s30 = smov 0   ;;  %s1146_s10 = smov 0  }
   0x6   :  { %s1148_s11 = smov 0   ;;  %s1150_s12 = smov 0  }
   0x7 LB: > { %s1165_s13 = sadd.s32 4294967295, %s1077_s12   ;;  %s781_s14 = sadd.s32 4294967294, %s1077_s12   ;;  %s1077_s12 = sphi %s1150_s12, %s1308_s12   ;;  %s1073_s11 = sphi %s1148_s11, %s1307_s11   ;;  %s1069_s10 = sphi %s1146_s10, %s1306_s10   ;;  %s1065_s30 = sphi %s1144_s30, %s1305_s30  }
   0x8   : > { %s1169_s15 = sadd.s32 1, %s1077_s12   ;;  %s225_s16 = sadd.s32 1, %s1073_s11 }
   0x9   : > { %s222_s17 = ssub.s32 %s1077_s12, %s1169_s15  ;;  %p235_p0 = scmp.ne.s32.totalorder %s1073_s11, %s1069_s10 }
   0xa   : > { %p223_p1 = scmp.eq.s32.totalorder %s222_s17, 0  ;;  %p236_p2 = scmp.eq.s32.totalorder %s1165_s13, 1 }
   0xb   : > { %p241_p3 = scmp.ne.s32.totalorder %s1069_s10, %s1065_s30  ;;  %p242_p4 = scmp.eq.s32.totalorder %s781_s14, 1 }
   0xc   : > { %s1180_s18 = scalar_select %p223_p1, %s1073_s11, %s225_s16  }
   0xd   : > { %p1182_p5 = por %p236_p2, %p235_p0  ;;  %p1186_p6 = por %p242_p4, %p241_p3 }
   0xe   : > { %p782_p7 = scmp.ge.s32.totalorder %s1077_s12, 1  ;;  %p249_p8 = scmp.lt.s32.totalorder %s1077_s12, 3 }
   0xf   : > { %p883_p9 = scmp.eq.s32.totalorder %s1165_s13, 0  ;;  %s1304_s1 = sld [smem:[#allocation11_spill]] }
  0x10   : > { %p1193_p10 = pnand %p782_p7, %p249_p8  ;;  %s1079_s25 = smov [#allocation2]  }
  0x11   : > { %s262_s26 = sshll.u32 %s1079_s25, 4  ;;  %s283_s29 = sshll.u32 %s1295_s5, 4  ;;  %s263_s26 = int_to_ptr.vmem [resolvable:$true] %s262_s26  ;;  %s284_s29 = int_to_ptr.hbm [resolvable:$true] %s283_s29 }
  0x12   : > { %p872_p11 = pneg %p1193_p10  ;;  %s1080_s14 = smov 128  }
  0x13   : > { %s1081_s16 = smov 8   ;;  %s1082_s17 = smov [#allocation5]  }
  0x14   : > { %p873_p12 = pnand %p883_p9, %p872_p11  ;;  %s285_s22 = sshll.u32 %s1082_s17, 4  ;;  %s286_s22 = int_to_ptr.vmem [resolvable:$true] %s285_s22 }
  0x15   : > { %s260_s24 = sshll.u32 %s1304_s1, 4  ;;  %s1083_s23 = smov 64   ;;  %s261_s24 = int_to_ptr.hbm [resolvable:$true] %s260_s24 }
  0x16   : > { %875 = dma.hbm_to_vmem [thread:$0]  (!%p873_p12), %s261_s24, 896, %s263_s26, [#allocation3], %s1080_s14, %s1080_s14, %s1081_s16  }
  0x17   : > { %s1084_s1 = smov 4   ;;  %317 = sbr.rel (%p1193_p10) target bundleno = 1294 (0x50e), region = 56 }
  0x18   : > { %878 = dma.hbm_to_vmem [thread:$0]  (!%p873_p12), %s284_s29, 256, %s286_s22, [#allocation6], %s1083_s23, %s1083_s23, %s1084_s1  }
  0x1c   : > { %1052 = dma.done.wait (%p883_p9), [#allocation3], 896  }
  0x1d   : > { %1054 = vsyncadd (%p883_p9), [#allocation3], 4294966400 }
  0x1e   : > { %1056 = dma.done.wait (%p883_p9), [#allocation6], 256  }
  0x1f   : > { %1058 = vsyncadd (%p883_p9), [#allocation6], 4294967040  ;;  %v370_v0 = vld [vmem:[#allocation2 + $0x30] sm:$0xff]  ;;  %vm410_vm0 = vcmask 1043456   ;;  %v809_v3 = vld [vmem:[#allocation2 + $0x20] sm:$0xf] }
  0x20   : > { %v390_v1 = vunpack.c.l.b16 %v370_v0  ;;  %v391_v2 = vunpack.c.h.b16 %v370_v0  ;;  %v855_v6 = vld [vmem:[#allocation2 + $0x24] sm:$0xf0]  ;;  %v854_v7 = vld [vmem:[#allocation2 + $0x24] sm:$0xf]  ;;  %v811_v8 = vld [vmem:[#allocation2 + $0x28] sm:$0xf0] }
  0x21   : > { %p358_p13 = scmp.lt.s32.totalorder %s1165_s13, 1  ;;  %v810_v11 = vor.u32 %v855_v6, %v809_v3  ;;  %v814_v12 = vor.u32 %v854_v7, %v811_v8  ;;  %v801_v13 = vld [vmem:[#allocation2 + $0x10] sm:$0xf]  ;;  %v853_v14 = vld [vmem:[#allocation2 + $0x14] sm:$0xf0]  ;;  %vm406_vm1 = vcmask 457728  }
  0x22   : > { %v398_v4 = vpack.c.b16 %v390_v1, %v390_v1  ;;  %v399_v5 = vpack.c.b16 %v391_v2, %v391_v2  ;;  %v852_v15 = vld [vmem:[#allocation2 + $0x14] sm:$0xf]  ;;  %v803_v16 = vld [vmem:[#allocation2 + $0x18] sm:$0xf0]  ;;  %v802_v17 = vor.u32 %v853_v14, %v801_v13  ;;  %v793_v19 = vld [vmem:[#allocation2] sm:$0xf] }
  0x23   : > { %s359_s1 = scalar_select %p358_p13, %s1165_s13, 1  ;;  %v806_v18 = vor.u32 %v852_v15, %v803_v16  ;;  %v851_v20 = vld [vmem:[#allocation2 + $0x4] sm:$0xf0]  ;;  %v850_v21 = vld [vmem:[#allocation2 + $0x4] sm:$0xf]  ;;  %vm471_vm2 = vcmask 916480  }
  0x24   : > { %v412_v9 = vsel %vm410_vm0, %v398_v4, 0  ;;  %v415_v10 = vsel %vm410_vm0, %v399_v5, 0  ;;  %v795_v22 = vld [vmem:[#allocation2 + $0x8] sm:$0xf0]  ;;  %v794_v23 = vor.u32 %v851_v20, %v793_v19  ;;  %s1085_s27 = smov 96   ;;  %s1086_s28 = smov 112  }
  0x25   : > { %421 = vmatpush.bf16.msra.mxu0 %v412_v9  ;;  %434 = vmatpush.bf16.msra.mxu1 %v415_v10  ;;  %s790_s21 = sshll.u32 %s359_s1, 2  ;;  %v798_v24 = vor.u32 %v850_v21, %v795_v22  ;;  %s1087_s29 = smov 120   ;;  %v857_v49 = vld [vmem:[%s1293_s3 + $0x8] sm:$0xff]  ;;  %v856_v50 = vld [vmem:[%s1293_s3] sm:$0xff]  ;;  %vm495_vm3 = vcmask 64512   ;;  %vm497_vm4 = vcmask 130048  }
  0x26   : > { %s361_s26 = scalar_lea.vmem %s1290_s0, %s790_s21  ;;  %s1088_s14 = smov 104   ;;  %536 = vmatpush.bf16.msra.mxu2 %v857_v49  ;;  %v935_v53 = vld [vmem:[%s1292_s2] ss:$0 sm:$0xff]  ;;  %vm526_vm5 = vcmask 261120   ;;  %v858_v8 = vld [vmem:[#allocation5] sm:$0xff] }
  0x27   : > { %v363_v25 = vld [vmem:[%s361_s26] sm:$0xf]  ;;  %s1089_s16 = smov 64   ;;  %s1090_s17 = smov 88  }
  0x28   : > { %s1091_s22 = smov 80   ;;  %s1092_s23 = smov 40   ;;  %v936_v61 = vld [vmem:[%s1294_s4] ss:$0 sm:$0xff] }
  0x29   : > { %422 = vmatpush.bf16.msra.mxu0 %v810_v11  ;;  %435 = vmatpush.bf16.msra.mxu1 %v814_v12  ;;  %v859_v6 = vld [vmem:[#allocation5 + $0x8] sm:$0xff]  ;;  %s355_s25 = sand.u32 1, %s1069_s10   ;;  %s847_s26 = sshll.u32 %s1165_s13, 3 }
  0x2a   : > { %537 = vmatpush.bf16.msra.mxu2 %v856_v50  ;;  %608 = vmatpush.bf16.msra.mxu3 %v859_v6  ;;  %s685_s13 = scalar_lea.sflag [#allocation4], %s355_s25 }
  0x2d   : > { %423 = vmatpush.bf16.msra.mxu0 %v802_v17  ;;  %436 = vmatpush.bf16.msra.mxu1 %v806_v18 }
  0x2e   : > { %609 = vmatpush.bf16.msra.mxu3 %v858_v8 }
  0x31   : > { %424 = vmatpush.bf16.msra.mxu0 %v794_v23  ;;  %437 = vmatpush.bf16.msra.mxu1 %v798_v24 }
  0x34   : > { %815 = vmatmul.msk.bf16.vlgmr.msra.gmra.mxu0 %vm406_vm1, %v363_v25  ;;  %816 = vmatmul.msk.bf16.vlgmr.msra.gmra.mxu1 %vm406_vm1, %v363_v25  ;;  %v937_v25 = vld [vmem:[%s1296_s6] ss:$0 sm:$0xff] }
  0xb1   : > { %v426_v26 = vpop.f32.mrf.mxu0  ;;  %v439_v27 = vpop.f32.mrf.mxu1 }
  0xb2   : > { %475 = vrot.lane.b32.xlu2 %v439_v27, %s1085_s27  ;;  %469 = vrot.lane.b32.xlu1 %v439_v27, %s1086_s28 }
  0xb3   : > { %444 = vrot.lane.b32.xlu0 %v426_v26, %s1087_s29  ;;  %s1093_s29 = smov 32  }
  0xb9   : > { %v428_v28 = vpop.f32.mrf.mxu0  ;;  %v441_v29 = vpop.f32.mrf.mxu1 }
  0xba   : > { %456 = vrot.lane.b32.xlu2 %v426_v26, %s1085_s27  ;;  %452 = vrot.lane.b32.xlu1 %v426_v26, %s1088_s14 }
  0xbb   : > { %448 = vrot.lane.b32.xlu0 %v426_v26, %s1086_s28  ;;  %s789_s28 = sshll.u32 %s355_s25, 3 }
  0xc2   : > { %483 = vrot.lane.b32.xlu2 %v439_v27, %s1089_s16  ;;  %460 = vrot.lane.b32.xlu1 %v426_v26, %s1090_s17  ;;  %s695_s16 = scalar_lea.hbm %s1299_s9, %s847_s26 }
  0xc3   : > { %479 = vrot.lane.b32.xlu0 %v439_v27, %s1091_s22  ;;  %s699_s21 = sshll.u32 %s695_s16, 4  ;;  %s700_s21 = int_to_ptr.hbm [resolvable:$true] %s699_s21 }
  0xcb   : > { %464 = vrot.lane.b32.xlu0 %v426_v26, %s1091_s22 }
 0x10c   : > { %v476_v30 = vpop.permute.xlu2 %475 }
 0x114   : > { %v457_v35 = vpop.permute.xlu2 %456 }
 0x11c   : > { %v484_v47 = vpop.permute.xlu2 %483 }
 0x124   : > { %v470_v31 = vpop.permute.xlu1 %469 }
 0x125   : > { %v445_v32 = vpop.permute.xlu0 %444 }
 0x126   : > { %v447_v33 = vmax.f32 %v426_v26, %v445_v32 }
 0x12c   : > { %v453_v34 = vpop.permute.xlu1 %452 }
 0x12d   : > { %v449_v36 = vpop.permute.xlu0 %448 }
 0x12e   : > { %v451_v37 = vmax.f32 %v447_v33, %v449_v36  ;;  %v472_v38 = vsel %vm471_vm2, %v449_v36, %v470_v31  ;;  %v860_v36 = vld [vmem:[%s1297_s7] sm:$0xff] }
 0x12f   : > { %v474_v40 = vmax.f32 %v426_v26, %v472_v38 }
 0x130   : > { %v455_v39 = vmax.f32 %v451_v37, %v453_v34  ;;  %v861_v34 = vld [vmem:[%s1297_s7 + $0x8] sm:$0xff] }
 0x131   : > { %v478_v43 = vmax.f32 %v474_v40, %v476_v30  ;;  %676 = vmatpush.bf16.msrb.mxu2 %v861_v34 }
 0x132   : > { %v459_v41 = vmax.f32 %v455_v39, %v457_v35 }
 0x134   : > { %v461_v42 = vpop.permute.xlu1 %460 }
 0x135   : > { %v463_v44 = vmax.f32 %v459_v41, %v461_v42  ;;  %v480_v45 = vpop.permute.xlu0 %479  ;;  %677 = vmatpush.bf16.msrb.mxu2 %v860_v36 }
 0x136   : > { %v482_v46 = vmax.f32 %v478_v43, %v480_v45 }
 0x137   : > { %488 = vrot.lane.b32.xlu1 %v463_v44, %s1091_s22 }
 0x138   : > { %v486_v48 = vmax.f32 %v482_v46, %v484_v47 }
 0x13a   : > { %492 = vrot.lane.b32.xlu2 %v486_v48, %s1092_s23  ;;  %s357_s23 = scalar_lea.vmem [#allocation7], %s789_s28  ;;  %s1027_s28 = scalar_lea.hbm %s1299_s9, 16 }
 0x13b   : > { %s697_s1 = sshll.u32 %s357_s23, 4  ;;  %s698_s1 = int_to_ptr.vmem [resolvable:$true] %s697_s1 }
 0x13d   : > { %v465_v51 = vpop.permute.xlu0 %464 }
 0x13e   : > { %v467_v52 = vmax.f32 %v463_v44, %v465_v51 }
 0x194   : > { %v493_v55 = vpop.permute.xlu2 %492 }
 0x1a9   : > { %v489_v54 = vpop.permute.xlu1 %488 }
 0x1aa   : > { %v496_v56 = vsel %vm495_vm3, %v467_v52, %v489_v54  ;;  %v938_v52 = vld [vmem:[%s1298_s8] ss:$0 sm:$0xff] }
 0x1ab   : > { %v498_v57 = vsel %vm497_vm4, %v496_v56, %v493_v55 }
 0x1ac   : > { %v503_v58 = vadd.f32 %v935_v53, %v498_v57 }
 0x1ae   : > { %v504_v59 = vmax.f32 %v503_v58, 0.0 }
 0x1b0   : > { %564 = vrot.lane.b32.xlu0 %v504_v59, %s1093_s29  ;;  %v505_v60 = vpack.c.bf16 %v504_v59, %v504_v59 }
 0x1b2   : > { %825 = vmatmul.msk.bf16.vlgmr.msra.gmra.mxu2 %vm526_vm5, %v505_v60 }
 0x222   : > { %v565_v18 = vpop.permute.xlu0 %564 }
 0x235   : > { %v539_v62 = vpop.f32.mrf.mxu2 }
 0x236   : > { %v540_v63 = vadd.f32 %v936_v61, %v539_v62 }
 0x238   : > { %v543_v0 = vmax.f32 %v540_v63, 0.0  ;;  %v826_v2 = vmul.f32 -1.442695, %v540_v63 }
 0x23a   : > { %570 = vrot.lane.b32.xlu1 %v543_v0, %s1093_s29  ;;  %939 = vpow2.f32 %v826_v2 }
 0x23d   : > { %v541_v1 = vpop.f32.mrf.mxu2 }
 0x240   : > { %v940_v3 = vpop.eup %939 }
 0x241   : > { %v547_v4 = vadd.f32 1.0, %v940_v3 }
 0x243   : > { %941 = vrcp.f32 %v547_v4  ;;  %v559_v12 = vand.u32 2147483648, %v547_v4  ;;  %vm553_vm7 = vweird.f32 %v547_v4  ;;  %v557_v13 = vand.u32 2147483647, %v547_v4 }
 0x245   : > { %v560_v15 = vor.u32 1.1754944e-38, %v559_v12  ;;  %vm558_vm9 = vcmp.eq.f32.partialorder %v557_v13, 8.507059e+37 }
 0x249   : > { %v942_v5 = vpop.eup %941 }
 0x24a   : > { %v549_v7 = vmul.f32 %v942_v5, %v547_v4  ;;  %vm554_vm6 = vweird.f32 %v942_v5 }
 0x24b   : > { %vm555_vm8 = vmor %vm553_vm7, %vm554_vm6 }
 0x24c   : > { %v550_v9 = vsub.f32 1.0, %v549_v7 }
 0x24e   : > { %v551_v10 = vmul.f32 %v942_v5, %v550_v9 }
 0x250   : > { %v552_v11 = vadd.f32 %v942_v5, %v551_v10 }
 0x252   : > { %v556_v14 = vsel %vm555_vm8, %v942_v5, %v552_v11 }
 0x253   : > { %v561_v16 = vsel %vm558_vm9, %v560_v15, %v556_v14 }
 0x254   : > { %v568_v17 = vsub.f32 1.0, %v561_v16  ;;  %v567_v20 = vmul.f32 %v565_v18, %v561_v16 }
 0x2ac   : > { %v571_v19 = vpop.permute.xlu1 %570 }
 0x2ad   : > { %v573_v21 = vmul.f32 %v571_v19, %v568_v17 }
 0x2af   : > { %v574_v22 = vadd.f32 %v573_v21, %v567_v20 }
 0x2b1   : > { %v575_v23 = vpack.c.bf16 %v574_v22, %v574_v22 }
 0x2b3   : > { %585 = vrot.lane.b32.xlu2 %v575_v23, %s1085_s27 }
 0x30d   : > { %v586_v24 = vpop.permute.xlu2 %585 }
 0x30e   : > { %835 = vmatmul.msk.bf16.vlgmr.msra.gmra.mxu3 %vm526_vm5, %v586_v24 }
 0x391   : > { %v611_v26 = vpop.f32.mrf.mxu3 }
 0x392   : > { %v612_v27 = vadd.f32 %v937_v25, %v611_v26 }
 0x394   : > { %v615_v28 = vmax.f32 %v612_v27, 0.0  ;;  %v836_v30 = vmul.f32 -1.442695, %v612_v27 }
 0x396   : > { %638 = vrot.lane.b32.xlu0 %v615_v28, %s1093_s29  ;;  %943 = vpow2.f32 %v836_v30 }
 0x399   : > { %v613_v29 = vpop.f32.mrf.mxu3 }
 0x39c   : > { %v944_v31 = vpop.eup %943 }
 0x39d   : > { %v619_v32 = vadd.f32 1.0, %v944_v31 }
 0x39f   : > { %945 = vrcp.f32 %v619_v32  ;;  %v631_v40 = vand.u32 2147483648, %v619_v32  ;;  %vm625_vm11 = vweird.f32 %v619_v32  ;;  %v629_v41 = vand.u32 2147483647, %v619_v32 }
 0x3a1   : > { %v632_v43 = vor.u32 1.1754944e-38, %v631_v40  ;;  %vm630_vm13 = vcmp.eq.f32.partialorder %v629_v41, 8.507059e+37 }
 0x3a5   : > { %v946_v33 = vpop.eup %945 }
 0x3a6   : > { %v621_v35 = vmul.f32 %v946_v33, %v619_v32  ;;  %vm626_vm10 = vweird.f32 %v946_v33 }
 0x3a7   : > { %vm627_vm12 = vmor %vm625_vm11, %vm626_vm10 }
 0x3a8   : > { %v622_v37 = vsub.f32 1.0, %v621_v35 }
 0x3aa   : > { %v623_v38 = vmul.f32 %v946_v33, %v622_v37 }
 0x3ac   : > { %v624_v39 = vadd.f32 %v946_v33, %v623_v38 }
 0x3ae   : > { %v628_v42 = vsel %vm627_vm12, %v946_v33, %v624_v39 }
 0x3af   : > { %v633_v44 = vsel %vm630_vm13, %v632_v43, %v628_v42 }
 0x3b0   : > { %v636_v45 = vsub.f32 1.0, %v633_v44  ;;  %v635_v47 = vmul.f32 %v633_v44, %v574_v22 }
 0x408   : > { %v639_v46 = vpop.permute.xlu0 %638 }
 0x409   : > { %v641_v48 = vmul.f32 %v639_v46, %v636_v45 }
 0x40b   : > { %v642_v49 = vadd.f32 %v641_v48, %v635_v47 }
 0x40d   : > { %v643_v50 = vpack.c.bf16 %v642_v49, %v642_v49 }
 0x40f   : > { %653 = vrot.lane.b32.xlu1 %v643_v50, %s1085_s27  ;;  %s1021_s27 = sshra.s32 %s700_s21, 4  ;;  %s1022_s27 = int_to_ptr.hbm [resolvable:$true] %s1021_s27 }
 0x410   : > { %s1023_s24 = scalar_lea.hbm %s1022_s27, 8  ;;  %p1028_p3 = scmp.lt.s32.totalorder %s1022_s27, %s1299_s9 }
 0x411   : > { %p1024_p0 = scmp.ne.s32.totalorder %s1022_s27, %s1023_s24  ;;  %p1029_p4 = scmp.lt.s32.totalorder %s1027_s28, %s1023_s24 }
 0x413   : > { %p1025_p1 = pnand %p1024_p0, %p1182_p5  ;;  %p1030_p7 = por %p1029_p4, %p1028_p3 }
 0x415   : > { %p1026_p2 = pneg %p1025_p1 }
 0x417   : > { %p1031_p8 = pnand %p1030_p7, %p1026_p2 }
 0x481   : > { %v654_v51 = vpop.permute.xlu1 %653 }
 0x482   : > { %845 = vmatmul.msk.bf16.vlgmr.msrb.gmra.mxu2 %vm526_vm5, %v654_v51 }
 0x505   : > { %v679_v53 = vpop.f32.mrf.mxu2 }
 0x506   : > { %v680_v54 = vadd.f32 %v938_v52, %v679_v53 }
 0x508   : > { %683 = vst.msk [vmem:[%s357_s23] sm:$0xff] %vm497_vm4, %v680_v54 }
 0x509   : > { %1034 = shalt.err (!%p1031_p8)
}
 0x50a   : > { %870 = dma.vmem_to_hbm [thread:$0]  (%p1182_p5), %s698_s1, 128, %s700_s21, %s685_s13  }
 0x50d   : > { %v681_v55 = vpop.f32.mrf.mxu2 }
 0x50e PF: > { %p887_p9 = scmp.ge.s32.totalorder %s1077_s12, 2  ;;  %s711_s25 = sand.u32 1, %s1065_s30  }
 0x50f   : > { %s712_s17 = scalar_lea.sflag [#allocation4], %s711_s25 }
 0x510   : > { %p880_p10 = pnand %p887_p9, %p1186_p6 }
 0x512   : > { %p881_p11 = pneg %p880_p10 }
 0x514   : > { %1060 = dma.done.wait (%p881_p11), %s712_s17, 128  }
 0x515   : > { %1062 = vsyncadd (%p881_p11), %s712_s17, 4294967168  ;;  %p21_p12 = scmp.ge.s32.totalorder %s1169_s15, 4   ;;  %s1305_s30 = smov %s1069_s10 }
 0x516   : > { %s1306_s10 = smov %s1073_s11  ;;  %s1307_s11 = smov %s1180_s18 }
 0x517   : > { %s1308_s12 = smov %s1169_s15  ;;  %23 = sbr.rel (!%p21_p12) target bundleno = 7 (0x7), region = 100 }
 0x51c   :  { %718 = vsyncpa [#allocation3], 1 }
 0x51d   :  { %720 = vsyncpa [#allocation3 + $0x1], 1 }
 0x51e   :  { %721 = vsyncpa [#allocation6], 1 }
 0x51f   :  { %722 = vsyncpa [#allocation4], 1 }
 0x520   :  { %724 = vsyncpa [#allocation4 + $0x1], 1 }

</bundles_post_ra>
